<compile_context>
chip_gen: v6e
topology: v6e:2x2x1
jax: 0.10.0
libtpu: 0.0.40
codegen_flags: <defaults>
</compile_context>

<pallas_src>
import math
from functools import partial

import jax
import jax.numpy as jnp
import numpy as np
from jax import lax
from jax.experimental import pallas as pl
from jax.experimental.pallas import tpu as pltpu


def _cdiv(a: int, b: int) -> int:
    return (a + b - 1) // b


def _round_up(x: int, m: int) -> int:
    return ((x + m - 1) // m) * m


def _resample_kernel(tbl_ref, lidx_ref, *refs, tk, length, two_blocks, mask_cols, precision):
    # tbl_ref  : SMEM int32, 3 entries per output-column tile: [klo, khi, use_hi]
    # lidx_ref : (1, TN) int32 band-local source index per output column (-1 = padding)
    # refs     : (x_lo[, x_hi], out, g_scratch)
    if two_blocks:
        xlo_ref, xhi_ref, o_ref, g_ref = refs
    else:
        xlo_ref, o_ref, g_ref = refs
        xhi_ref = None

    j = pl.program_id(0)  # output-column tile (outer, "parallel")
    i = pl.program_id(1)  # row tile          (inner, "arbitrary")

    # Build the banded one-hot gather tile once per output-column tile; it stays VMEM
    # resident across all row tiles because the row axis is the inner grid axis.
    @pl.when(i == 0)
    def _():
        row_pos = lax.broadcasted_iota(jnp.int32, g_ref.shape, 0)
        g_ref[...] = (row_pos == lidx_ref[...]).astype(g_ref.dtype)

    xlo = xlo_ref[...]
    if mask_cols:
        # x was not padded on host: zero the stale tail of a partial edge block so that
        # garbage (possibly NaN/Inf) times a zero one-hot entry cannot reach valid outputs.
        klo = tbl_ref[3 * j]
        cols = lax.broadcasted_iota(jnp.int32, xlo.shape, 1)
        xlo = jnp.where(cols + klo * tk < length, xlo, jnp.zeros_like(xlo))

    g_lo = g_ref[pl.ds(0, tk), :] if two_blocks else g_ref[...]
    acc = jnp.dot(xlo, g_lo, preferred_element_type=jnp.float32, precision=precision)

    if two_blocks:
        use_hi = tbl_ref[3 * j + 2]

        @pl.when(use_hi == 0)
        def _():
            o_ref[...] = acc.astype(o_ref.dtype)

        @pl.when(use_hi != 0)
        def _():
            xhi = xhi_ref[...]
            if mask_cols:
                khi = tbl_ref[3 * j + 1]
                cols_hi = lax.broadcasted_iota(jnp.int32, xhi.shape, 1)
                xhi = jnp.where(cols_hi + khi * tk < length, xhi, jnp.zeros_like(xhi))
            acc2 = acc + jnp.dot(xhi, g_ref[pl.ds(tk, tk), :],
                                 preferred_element_type=jnp.float32, precision=precision)
            o_ref[...] = acc2.astype(o_ref.dtype)
    else:
        o_ref[...] = acc.astype(o_ref.dtype)


def resample_nearest(x: jax.Array, rate: float, *, tile_rows: int = 256, tile_n: int = 512) -> jax.Array:
    """Nearest-neighbour resample of x along its last axis by `rate` (host-static rate)."""
    if tile_rows % 8:
        raise ValueError("tile_rows must be a multiple of 8")
    if tile_n % 128:
        raise ValueError("tile_n must be a multiple of 128")

    *lead, L = x.shape
    rows = int(np.prod(lead)) if lead else 1
    dtype = x.dtype
    itemsize = jnp.dtype(dtype).itemsize

    # --- host-side static index computation (mirrors torch.arange/round/clamp) ---
    step = 1.0 / float(rate)
    idx = np.arange(0.0, float(L), step)
    idx = np.clip(np.round(idx).astype(np.int64), 0, L - 1)
    L_out = int(idx.shape[0])

    # --- tiling: full-dim blocks for small dims, cdiv partial edge blocks otherwise ---
    TR = rows if rows <= tile_rows else tile_rows
    n_row_t = _cdiv(rows, TR)
    TN = L_out if L_out <= tile_n else tile_n
    n_col_t = _cdiv(L_out, TN)

    # Contiguous input-column band per output tile (idx is monotone).  TK >= max band
    # width guarantees a band spans at most two consecutive TK blocks.
    t_lo = np.arange(n_col_t) * TN
    t_hi = np.minimum(t_lo + TN, L_out) - 1
    starts = idx[t_lo]
    ends = idx[t_hi]
    band_max = int((ends - starts).max()) + 1

    TK0 = _round_up(band_max, 128)
    if L <= TK0:
        TK = L                                   # whole signal fits in one column block
        klo = np.zeros(n_col_t, np.int64)
        khi_fetch = np.zeros(n_col_t, np.int64)
        use_hi = np.zeros(n_col_t, np.int64)
        two_blocks = False
    else:
        TK = TK0
        klo = starts // TK
        khi = ends // TK                          # guaranteed in {klo, klo + 1}
        use_hi = (khi > klo).astype(np.int64)
        khi_fetch = np.where(use_hi > 0, khi, klo)
        two_blocks = bool(use_hi.any())
    mask_cols = (L % TK) != 0

    # SMEM window table (flattened 1-D to avoid 2-D SMEM padding blow-up).
    tbl = np.stack([klo, khi_fetch, use_hi], axis=1).reshape(-1).astype(np.int32)
    # Band-local source index per output column (the only "G" data shipped to the kernel).
    col_tile = np.arange(L_out) // TN
    lidx = np.full((1, n_col_t * TN), -1, np.int32)
    lidx[0, :L_out] = (idx - klo[col_tile] * TK).astype(np.int32)

    x2d = x.reshape(rows, L)  # no jnp.pad: no extra HBM copy of the input

    # f32: exact gather on the MXU (3-pass HIGHEST over the minimal band); bf16: fast path.
    precision = lax.Precision.HIGHEST if dtype == jnp.float32 else None
    gk = TK * (2 if two_blocks else 1)

    kernel = partial(_resample_kernel, tk=TK, length=L, two_blocks=two_blocks,
                     mask_cols=mask_cols, precision=precision)

    in_specs = [
        pl.BlockSpec((1, TN), lambda j, i, tab: (0, j)),             # local index row
        pl.BlockSpec((TR, TK), lambda j, i, tab: (i, tab[3 * j])),   # low band block of x
    ]
    x_args = (x2d,)
    if two_blocks:
        in_specs.append(pl.BlockSpec((TR, TK), lambda j, i, tab: (i, tab[3 * j + 1])))
        x_args = (x2d, x2d)

    n_hi = int(use_hi.sum())
    cost = pl.CostEstimate(
        flops=int(2 * rows * TK * TN * (n_col_t + n_hi)),
        transcendentals=0,
        bytes_accessed=int(itemsize * (n_row_t * n_col_t * TR * TK * (2 if two_blocks else 1)
                                       + rows * L_out) + 4 * n_col_t * TN),
    )

    # Working-set estimate: G scratch + double-buffered x windows + double-buffered output.
    est = (gk * TN + 2 * (2 if two_blocks else 1) * TR * TK + 2 * TR * TN) * itemsize + 8 * TN
    vmem_limit = int(min(48 << 20, max(24 << 20, 2 * est)))  # <= 48 MiB: safe on v7x (64 MiB)

    out = pl.pallas_call(
        kernel,
        out_shape=jax.ShapeDtypeStruct((rows, L_out), dtype),
        grid_spec=pltpu.PrefetchScalarGridSpec(
            num_scalar_prefetch=1,
            grid=(n_col_t, n_row_t),   # column tiles outer, row tiles inner
            in_specs=in_specs,
            out_specs=pl.BlockSpec((TR, TN), lambda j, i, tab: (i, j)),
            scratch_shapes=[pltpu.VMEM((gk, TN), dtype)],
        ),
        compiler_params=pltpu.CompilerParams(
            dimension_semantics=("parallel", "arbitrary"),
            vmem_limit_bytes=vmem_limit,
        ),
        cost_estimate=cost,
    )(jnp.asarray(tbl), jnp.asarray(lidx), *x_args)

    return out.reshape(*lead, L_out)


def resample_nearest_module(x: jax.Array, key: jax.Array,
                            rates=(0.5, 1.5), p: float = 1.0,
                            rate_granularity: float = 1.0 / 64.0):
    """Forward pass of ResampleNearest. Returns (y, rates_applied)."""
    floor_p = math.floor(p)
    # TODO(synk): the fractional-p Bernoulli skip in the reference is host-side Python RNG
    # control flow; only the deterministic floor(p) applications are executed here.
    applied = []
    for _ in range(floor_p):
        key, sub = jax.random.split(key)
        if rates[0] == rates[1]:
            rate = float(rates[0])
        else:
            rate = float(jax.random.uniform(sub, (), minval=rates[0], maxval=rates[1]))
            if rate_granularity:
                # Quantize the sampled rate so repeated calls reuse a small set of compiled
                # kernels instead of re-tracing / recompiling for every fresh random rate.
                rate = rates[0] + round((rate - rates[0]) / rate_granularity) * rate_granularity
                rate = float(min(max(rate, rates[0]), rates[1]))
        applied.append(rate)
        x = resample_nearest(x, rate)
    return x, applied


if __name__ == "__main__":
    key = jax.random.PRNGKey(0)
    k_x, k_mod, k_big = jax.random.split(key, 3)

    def ref_resample(x_np, rate):
        L = x_np.shape[-1]
        step = 1.0 / rate
        ridx = np.clip(np.round(np.arange(0.0, float(L), step)).astype(np.int64), 0, L - 1)
        return x_np[..., ridx]

    # 1) Module forward: random (quantized) rate in [0.5, 1.5), p=1.0, f32, small shape.
    B, C, L = 2, 4, 16
    x = jax.random.normal(k_x, (B, C, L), dtype=jnp.float32)
    y, rates_applied = resample_nearest_module(x, k_mod, rates=(0.5, 1.5), p=1.0)
    y = jax.block_until_ready(y)
    y_ref = np.asarray(x)
    for r in rates_applied:
        y_ref = ref_resample(y_ref, r)
    np.testing.assert_allclose(np.asarray(y), y_ref, rtol=1e-6, atol=1e-6)

    # 2) Fixed down-sampling rate, f32 (single-band path, exact-precision MXU gather).
    y2 = jax.block_until_ready(resample_nearest(x, 0.75))
    np.testing.assert_allclose(np.asarray(y2), ref_resample(np.asarray(x), 0.75),
                               rtol=1e-6, atol=1e-6)

    # 3) Fixed up-sampling rate, bf16 (fast bf16 MXU path; bit-exact by construction).
    xb = x.astype(jnp.bfloat16)
    y3 = jax.block_until_ready(resample_nearest(xb, 1.3))
    np.testing.assert_array_equal(
        np.asarray(y3.astype(jnp.float32)),
        ref_resample(np.asarray(xb.astype(jnp.float32)), 1.3),
    )

    # 4) Longer signal: multi-tile columns, two-block band, partial edge blocks, f32 down-sampling.
    x4 = jax.random.normal(k_big, (2, 3, 1000), dtype=jnp.float32)
    y4 = jax.block_until_ready(resample_nearest(x4, 0.7))
    np.testing.assert_allclose(np.asarray(y4), ref_resample(np.asarray(x4), 0.7),
                               rtol=1e-6, atol=1e-6)

    # 5) Longer signal, up-sampling, bf16 (exercises the gated second dot per tile).
    x5 = x4.astype(jnp.bfloat16)
    y5 = jax.block_until_ready(resample_nearest(x5, 1.25))
    np.testing.assert_array_equal(
        np.asarray(y5.astype(jnp.float32)),
        ref_resample(np.asarray(x5.astype(jnp.float32)), 1.25),
    )

    print("KERNEL_OK")
</pallas_src>

<mosaic_0001>
module attributes {stable_mosaic.version = 11 : i64} {
  func.func @_resample_kernel(%arg0: i32, %arg1: i32, %arg2: memref<3xi32, #tpu.memory_space<smem>>, %arg3: memref<1x10xi32, #tpu.memory_space<vmem>>, %arg4: memref<8x16xf32, #tpu.memory_space<vmem>>, %arg5: memref<8x10xf32, #tpu.memory_space<vmem>>, %arg6: memref<16x10xf32, #tpu.memory_space<vmem>>) attributes {dimension_semantics = [#tpu.dimension_semantics<parallel>, #tpu.dimension_semantics<arbitrary>], iteration_bounds = array<i64: 1, 1>, scalar_prefetch = 1 : i64, scratch_operands = 1 : i64, tpu.core_type = #tpu.core_type<tc>, window_params = [{transform_indices = @transform_0, window_bounds = array<i64: 1, 10>}, {transform_indices = @transform_1, window_bounds = array<i64: 8, 16>}, {transform_indices = @transform_2, window_bounds = array<i64: 8, 10>}]} {
    %c0_i32 = arith.constant 0 : i32
    %0 = arith.cmpi eq, %arg1, %c0_i32 : i32
    %1 = arith.extui %0 : i1 to i32
    %c0_i32_0 = arith.constant 0 : i32
    %2 = arith.cmpi ne, %1, %c0_i32_0 : i32
    scf.if %2 {
      %7 = tpu.iota {dimensions = array<i32: 0>} : vector<16x10xi32>
      %c0_6 = arith.constant 0 : index
      %c0_7 = arith.constant 0 : index
      %8 = vector.load %arg3[%c0_6, %c0_7] : memref<1x10xi32, #tpu.memory_space<vmem>>, vector<1x10xi32>
      %9 = vector.broadcast %8 : vector<1x10xi32> to vector<16x10xi32>
      %10 = arith.cmpi eq, %7, %9 : vector<16x10xi32>
      %11 = arith.extui %10 : vector<16x10xi1> to vector<16x10xi32>
      %12 = arith.sitofp %11 : vector<16x10xi32> to vector<16x10xf32>
      %c0_8 = arith.constant 0 : index
      %c0_9 = arith.constant 0 : index
      %13 = vector.load %arg6[%c0_8, %c0_9] : memref<16x10xf32, #tpu.memory_space<vmem>>, vector<16x10xf32>
      tpu.vector_store %arg6[%c0_8, %c0_9], %12 {strides = array<i32>} : memref<16x10xf32, #tpu.memory_space<vmem>>, vector<16x10xf32>,
    } else {
    }
    %c0 = arith.constant 0 : index
    %c0_1 = arith.constant 0 : index
    %3 = vector.load %arg4[%c0, %c0_1] : memref<8x16xf32, #tpu.memory_space<vmem>>, vector<8x16xf32>
    %c0_2 = arith.constant 0 : index
    %c0_3 = arith.constant 0 : index
    %4 = vector.load %arg6[%c0_2, %c0_3] : memref<16x10xf32, #tpu.memory_space<vmem>>, vector<16x10xf32>
    %cst = arith.constant dense<0.000000e+00> : vector<8x10xf32>
    %5 = tpu.matmul %3, %4, %cst {dimension_numbers = #tpu.dot_dimension_numbers<[1], [0], [0], [1], [0, 0, 1, 1], [], []>, precision = #tpu.contract_precision<fp32>} : vector<8x16xf32>, vector<16x10xf32>, vector<8x10xf32> -> vector<8x10xf32>
    %c0_4 = arith.constant 0 : index
    %c0_5 = arith.constant 0 : index
    %6 = vector.load %arg5[%c0_4, %c0_5] : memref<8x10xf32, #tpu.memory_space<vmem>>, vector<8x10xf32>
    tpu.vector_store %arg5[%c0_4, %c0_5], %5 {strides = array<i32>} : memref<8x10xf32, #tpu.memory_space<vmem>>, vector<8x10xf32>,
    return
  }
  func.func @transform_0(%arg0: i32, %arg1: i32, %arg2: memref<3xi32, #tpu.memory_space<smem>>) -> (i32, i32) {
    %c0_i32 = arith.constant 0 : i32
    %c0_i32_0 = arith.constant 0 : i32
    return %c0_i32, %arg0 : i32, i32
  }
  func.func @transform_1(%arg0: i32, %arg1: i32, %arg2: memref<3xi32, #tpu.memory_space<smem>>) -> (i32, i32) {
    %c3_i32 = arith.constant 3 : i32
    %0 = arith.muli %c3_i32, %arg0 : i32
    %1 = arith.index_cast %0 : i32 to index
    %2 = memref.load %arg2[%1] : memref<3xi32, #tpu.memory_space<smem>>
    %c0_i32 = arith.constant 0 : i32
    return %arg1, %2 : i32, i32
  }
  func.func @transform_2(%arg0: i32, %arg1: i32, %arg2: memref<3xi32, #tpu.memory_space<smem>>) -> (i32, i32) {
    %c0_i32 = arith.constant 0 : i32
    return %arg1, %arg0 : i32, i32
  }
}

</mosaic_0001>

<bundles_post_ra>
// kernel: tpu_custom_call.1
= control target key start
LH: loop header
LB: loop body
LE: loop exit
PB: predicated region body
PF: predicated region fallthrough
CT: control target
= control target key end

     0   :  { %s666_s12 = smov [#allocation4]   ;;  %s738_s0 = inlined_call_operand.hbm [shape: s32[3], index: 0, kind: input, shape index: {}]   ;;  %s739_s1 = inlined_call_operand.vmem [shape: s32[1,10], index: 1, kind: input, shape index: {}]   ;;  %s740_s2 = inlined_call_operand.hbm [shape: f32[8,16], index: 2, kind: input, shape index: {}]   ;;  %s741_s3 = inlined_call_operand.hbm [shape: f32[8,10], index: 3, kind: output, shape index: {}]  }
   0x1   :  { %9 = dma.hbm_to_smem %s738_s0, 16, %s666_s12, [#allocation3] }
   0x2   :  { %660 = dma.done.wait [#allocation3], 16 }
   0x3   :  { %661 = vsyncadd [#allocation3], 4294967280 }
   0x4   :  { %11 = sfence }
   0x5   :  { %12 = vsyncpa [#allocation6], 0 }
   0x6   :  { %13 = vsyncpa [#allocation7], 0  ;;  %s19_s15 = sld [smem:[#allocation4]]  ;;  %s667_s16 = smov [#allocation5]  }
   0x7   :  { %s26_s17 = sshll.u32 %s667_s16, 4  ;;  %s620_s0 = scalar_lea.hbm %s740_s2, 128  ;;  %s27_s17 = int_to_ptr.vmem [resolvable:$true] %s26_s17 }
   0xc   :  { %s541_s18 = sshll.u32 %s19_s15, 7 }
   0xd   :  { %s24_s21 = scalar_lea.hbm %s740_s2, %s541_s18 }
   0xe   :  { %s618_s22 = scalar_lea.hbm %s24_s21, 128  ;;  %p621_p1 = scmp.lt.s32.totalorder %s24_s21, %s740_s2 }
   0xf   :  { %p619_p0 = scmp.ne.s32.totalorder %s24_s21, %s618_s22  ;;  %p622_p2 = scmp.lt.s32.totalorder %s620_s0, %s618_s22 }
  0x11   :  { %p623_p3 = por %p622_p2, %p621_p1 }
  0x13   :  { %p624_p4 = pnand %p623_p3, %p619_p0 }
  0x15   :  { %627 = shalt.err (!%p624_p4)
}
  0x16   :  { %s628_s27 = scalar_lea.vmem %s27_s17, 128  ;;  %p633_p6 = scmp.lt.s32.totalorder %s27_s17, %s27_s17 }
  0x17   :  { %p629_p5 = scmp.ne.s32.totalorder %s27_s17, %s628_s27  ;;  %p634_p7 = scmp.lt.s32.totalorder %s628_s27, %s628_s27 }
  0x19   :  { %p635_p8 = por %p634_p7, %p633_p6 }
  0x1b   :  { %p636_p9 = pnand %p635_p8, %p629_p5 }
  0x1d   :  { %639 = shalt.err (!%p636_p9)
}
  0x1e   :  { %29 = dma.hbm_to_vmem [thread:$0]  %s24_s21, 128, %s27_s17, [#allocation6]  }
  0x1f   :  { %662 = dma.done.wait [#allocation6], 128  }
  0x20   :  { %663 = vsyncadd [#allocation6], 4294967168  ;;  %v39_v0 = vlaneseq  ;;  %v668_v1 = vmov 0.0   ;;  %vm669_vm0 = vmmov 0   ;;  %vm59_vm1 = vcmask 130048   ;;  %v56_v5 = vld [vmem:[#allocation5] sm:$0xff] }
  0x21   :  { %563 = vmatprep.subr.mxu0 %v668_v1  ;;  %567 = vmatprep.mubr.msk.f32.mxu0 %vm669_vm0, %v668_v1  ;;  %v542_v4 = vld [vmem:[%s739_s1] ss:$0 sm:$0xff]  ;;  %vm53_vm2 = vcmask 80896   ;;  %v61_v6 = vsel %vm59_vm1, %v56_v5, 0  ;;  %s670_s1 = smov [#allocation8]  }
  0x22   :  { %v40_v2 = vshrl.u32 %v39_v0, 7  ;;  %570 = vmatprep.subr.mxu1 %v668_v1  ;;  %574 = vmatprep.mubr.msk.f32.mxu1 %vm669_vm0, %v668_v1  ;;  %v130_v9 = vand.u32 4294901760, %v61_v6  ;;  %s530_s29 = sshll.u32 %s670_s1, 4  ;;  %s531_s29 = int_to_ptr.vmem [resolvable:$true] %s530_s29 }
  0x23   :  { %s640_s30 = scalar_lea.vmem %s531_s29, 128  ;;  %p645_p11 = scmp.lt.s32.totalorder %s531_s29, %s531_s29 }
  0x24   :  { %v41_v3 = vadd.s32 8, %v40_v2  ;;  %vm47_vm3 = vcmp.eq.s32.totalorder %v40_v2, %v542_v4  ;;  %v131_v10 = vsub.f32 %v61_v6, %v130_v9  ;;  %p641_p10 = scmp.ne.s32.totalorder %s531_s29, %s640_s30  ;;  %p646_p12 = scmp.lt.s32.totalorder %s640_s30, %s640_s30 }
  0x25   :  { %v543_v7 = vsel %vm47_vm3, 1.0, %v668_v1 }
  0x26   :  { %vm48_vm4 = vcmp.eq.s32.totalorder %v41_v3, %v542_v4  ;;  %54 = vst.msk [vmem:[#allocation2] sm:$0xff] %vm53_vm2, %v543_v7  ;;  %v132_v11 = vand.u32 4294901760, %v131_v10  ;;  %p647_p13 = por %p646_p12, %p645_p11 }
  0x27   :  { %v544_v8 = vsel %vm48_vm4, 1.0, %v668_v1 }
  0x28   :  { %55 = vst.msk [vmem:[#allocation2 + $0x8] sm:$0xff] %vm53_vm2, %v544_v8  ;;  %v133_v12 = vsub.f32 %v131_v10, %v132_v11  ;;  %p648_p0 = pnand %p647_p13, %p641_p10 }
  0x2a   :  { %v134_v17 = vand.u32 4294901760, %v133_v12 }
  0x2d   :  { %v57_v14 = vld [vmem:[#allocation2] sm:$0xff] }
  0x2e   :  { %v95_v16 = vand.u32 4294901760, %v57_v14 }
  0x2f   :  { %v58_v13 = vld [vmem:[#allocation2 + $0x8] sm:$0xff] }
  0x30   :  { %v92_v15 = vand.u32 4294901760, %v58_v13  ;;  %v177_v19 = vsub.f32 %v57_v14, %v95_v16 }
  0x32   :  { %564 = vmatpush3.msra.mxu0 %v92_v15  ;;  %v170_v18 = vsub.f32 %v58_v13, %v92_v15  ;;  %v178_v21 = vand.u32 4294901760, %v177_v19 }
  0x33   :  { %565 = vmatprep.subr.mxu0 %v668_v1 }
  0x34   :  { %566 = vmatpush3.msra.mxu0 %v95_v16  ;;  %v171_v20 = vand.u32 4294901760, %v170_v18  ;;  %v179_v23 = vsub.f32 %v177_v19, %v178_v21 }
  0x35   :  { %568 = vmatmul.mubr.f32.vlgmr.msra.gmra.mxu0 %v134_v17  ;;  %577 = vmatprep.subr.mxu0 %v668_v1 }
  0x36   :  { %v172_v22 = vsub.f32 %v170_v18, %v171_v20  ;;  %578 = vmatpush3.msra.mxu0 %v170_v18  ;;  %581 = vmatprep.mubr.msk.f32.mxu0 %vm669_vm0, %v668_v1  ;;  %v180_v25 = vand.u32 4294901760, %v179_v23 }
  0x37   :  { %579 = vmatprep.subr.mxu0 %v668_v1 }
  0x38   :  { %v173_v24 = vand.u32 4294901760, %v172_v22  ;;  %580 = vmatpush3.msra.mxu0 %v177_v19 }
  0x39   :  { %582 = vmatmul.mubr.f32.vlgmr.msra.gmra.mxu0 %v131_v10  ;;  %591 = vmatprep.subr.mxu0 %v668_v1 }
  0x3a   :  { %571 = vmatpush3.msra.mxu1 %v173_v24  ;;  %592 = vmatpush3.msra.mxu0 %v171_v20 }
  0x3b   :  { %572 = vmatprep.subr.mxu1 %v668_v1  ;;  %593 = vmatprep.subr.mxu0 %v668_v1 }
  0x3c   :  { %573 = vmatpush3.msra.mxu1 %v180_v25  ;;  %594 = vmatpush3.msra.mxu0 %v178_v21 }
  0x3d   :  { %575 = vmatmul.mubr.f32.vlgmr.msra.gmra.mxu1 %v130_v9  ;;  %584 = vmatprep.subr.mxu1 %v668_v1 }
  0x3e   :  { %585 = vmatpush3.msra.mxu1 %v92_v15  ;;  %588 = vmatprep.mubr.msk.f32.mxu1 %vm669_vm0, %v668_v1 }
  0x3f   :  { %586 = vmatprep.subr.mxu1 %v668_v1  ;;  %595 = vmatprep.mubr.msk.f32.mxu0 %vm669_vm0, %v668_v1 }
  0x40   :  { %587 = vmatpush3.msra.mxu1 %v95_v16  ;;  %596 = vmatmul.mubr.f32.vlgmr.msra.gmra.mxu0 %v130_v9 }
  0x41   :  { %589 = vmatmul.mubr.f32.vlgmr.msra.gmra.mxu1 %v132_v11  ;;  %598 = vmatprep.subr.mxu1 %v668_v1 }
  0x42   :  { %599 = vmatpush3.msra.mxu1 %v92_v15  ;;  %602 = vmatprep.mubr.msk.f32.mxu1 %vm669_vm0, %v668_v1 }
  0x43   :  { %600 = vmatprep.subr.mxu1 %v668_v1 }
  0x44   :  { %601 = vmatpush3.msra.mxu1 %v95_v16 }
  0x45   :  { %603 = vmatmul.mubr.f32.vlgmr.msra.gmra.mxu1 %v130_v9 }
  0xf5   :  { %v136_v26 = vpop.f32.mrf.mxu0 }
  0xf7   :  { %v569_v27 = vpop.f32.mrf.mxu0 }
  0xf9   :  { %v293_v28 = vpop.f32.mrf.mxu0 }
  0xfb   :  { %v583_v29 = vpop.f32.mrf.mxu0 }
  0xfd   :  { %v217_v30 = vpop.f32.mrf.mxu1 }
  0xfe   :  { %v218_v31 = vadd.f32 %v217_v30, %v136_v26 }
  0xff   :  { %v576_v32 = vpop.f32.mrf.mxu1 }
 0x100   :  { %v294_v33 = vadd.f32 %v293_v28, %v218_v31  ;;  %v445_v34 = vpop.f32.mrf.mxu0 }
 0x101   :  { %v368_v35 = vpop.f32.mrf.mxu1 }
 0x102   :  { %v369_v36 = vadd.f32 %v368_v35, %v294_v33  ;;  %v597_v37 = vpop.f32.mrf.mxu0 }
 0x103   :  { %v590_v38 = vpop.f32.mrf.mxu1 }
 0x104   :  { %v446_v39 = vadd.f32 %v445_v34, %v369_v36 }
 0x105   :  { %v518_v40 = vpop.f32.mrf.mxu1 }
 0x106   :  { %v519_v41 = vadd.f32 %v518_v40, %v446_v39 }
 0x107   :  { %v604_v42 = vpop.f32.mrf.mxu1 }
 0x108   :  { %523 = vst.msk [vmem:[#allocation8] sm:$0xff] %vm53_vm2, %v519_v41 }
 0x109   :  { %651 = shalt.err (!%p648_p0)
}
 0x10a   :  { %533 = dma.vmem_to_hbm [thread:$0]  %s531_s29, 128, %s741_s3, [#allocation7]  }
 0x10b   :  { %664 = dma.done.wait [#allocation7], 128  }
 0x10c   :  { %665 = vsyncadd [#allocation7], 4294967168 }
 0x10d   :  { %537 = vsyncpa [#allocation6], 1 }
 0x10e   :  { %538 = vsyncpa [#allocation7], 1 }

</bundles_post_ra>
